<compile_context>
chip_gen: v6e
topology: v6e:2x2x1
jax: 0.10.0
libtpu: 0.0.40
codegen_flags: <defaults>
</compile_context>

<pallas_src>
import jax
import jax.numpy as jnp
import numpy as np
from jax.experimental import pallas as pl
from jax.experimental.pallas import tpu as pltpu

LOVASZ_IGNORE = 255  # lovasz_softmax(..., ignore=255) in the reference module


# ---------------------------------------------------------------------------
# Fused kernel: softmax (both heads) + weighted-CE partials + lovasz errors
# ---------------------------------------------------------------------------
def _fused_semantic_kernel(x1_ref, x2_ref, y_ref, w_ref,
                           err_ref, part_ref,
                           acc1_ref, acc2_ref, accw_ref):
    """One (batch n, pixel-tile i) step."""
    i = pl.program_id(1)
    last = i == pl.num_programs(1) - 1

    @pl.when(i == 0)
    def _():
        acc1_ref[...] = jnp.zeros_like(acc1_ref)
        acc2_ref[...] = jnp.zeros_like(acc2_ref)
        accw_ref[...] = jnp.zeros_like(accw_ref)

    x1 = x1_ref[...].astype(jnp.float32)          # (C, TP) head-1 logits
    x2 = x2_ref[...].astype(jnp.float32)          # (C, TP) head-2 logits
    y = y_ref[...]                                # (1, TP) int32 labels
    w = w_ref[...].astype(jnp.float32)            # (C, 1)  class weights

    cls = jax.lax.broadcasted_iota(jnp.int32, x1.shape, 0)
    onehot = (cls == y).astype(jnp.float32)       # (C, TP)
    ow = onehot * w                               # (C, TP): row c = w[c]*1{y==c}

    # numerically-stable softmax / log-softmax over the class (sublane) axis
    m1 = jnp.max(x1, axis=0, keepdims=True)
    ex1 = jnp.exp(x1 - m1)
    den1 = jnp.sum(ex1, axis=0, keepdims=True)
    logp1 = (x1 - m1) - jnp.log(den1)
    probs1 = ex1 * pl.reciprocal(den1, approx=True)   # EUP rcp, off the VPU path

    # second head: CE only (no probabilities / error map needed)
    m2 = jnp.max(x2, axis=0, keepdims=True)
    logp2 = (x2 - m2) - jnp.log(jnp.sum(jnp.exp(x2 - m2), axis=0, keepdims=True))

    # fused weighted cross-entropy partials: nn.CrossEntropyLoss(weight=w,
    # reduction='mean') == sum_i w[y_i]*nll_i / sum_i w[y_i].
    # Labels == 255 (ignore / padding) have an all-zero onehot -> contribute 0
    # to both numerator and denominator.
    acc1_ref[...] += -jnp.sum(ow * logp1, axis=0, keepdims=True)   # (1, TP)
    acc2_ref[...] += -jnp.sum(ow * logp2, axis=0, keepdims=True)   # (1, TP)
    accw_ref[...] += jnp.sum(ow, axis=0, keepdims=True)            # (1, TP)

    # lovasz-softmax per-class |fg - p_c| errors.  Ignored / padded pixels
    # (label == 255) are zeroed; they sort to the tail of the descending sort
    # and contribute exactly zero, matching the reference implementation.
    valid = (y != LOVASZ_IGNORE).astype(jnp.float32)               # (1, TP)
    fg = onehot * valid
    err_ref[...] = jnp.abs(fg - probs1) * valid

    @pl.when(last)
    def _():
        # Single per-n partials block: rows 0/1/2 = (w*nll1, w*nll2, w) sums.
        s1 = jnp.sum(acc1_ref[...], keepdims=True)                 # (1, 1)
        s2 = jnp.sum(acc2_ref[...], keepdims=True)
        sw = jnp.sum(accw_ref[...], keepdims=True)
        row = jax.lax.broadcasted_iota(jnp.int32, (8, 1), 0)
        part_ref[...] = jnp.where(row == 0, s1,
                                  jnp.where(row == 1, s2,
                                            jnp.where(row == 2, sw, 0.0)))


# ---------------------------------------------------------------------------
# Tiling helpers (generation-aware VMEM sizing)
# ---------------------------------------------------------------------------
def _round_up(x, m):
    return ((x + m - 1) // m) * m


def _vmem_capacity_bytes(default=64 * 1024 * 1024):
    """Physical VMEM of the local TPU generation (fallback: v7x's 64 MiB)."""
    try:
        cap = getattr(pltpu.get_tpu_info(), "vmem_capacity_bytes", None)
        if cap:
            return int(cap)
    except Exception:
        pass
    return default


def _choose_tiling(hw, c, vmem_budget, max_tile=16384):
    """Pick (tile_p, hw_pad).

    tile_p: largest multiple of 128 (<= max_tile) whose double-buffered
    working set (2 logits tiles + error tile + labels + scratch rows) fits
    vmem_budget.  If hw has no large multiple-of-128 divisor, the pixel axis
    is padded up to a multiple of the full-size tile instead of falling back
    to a full-row block (which could blow past VMEM for real image sizes).
    """
    c_pad = _round_up(c, 8)
    # double-buffered: x1 + x2 + err (c_pad rows each) + labels (8 rows),
    # plus 3 single-buffered scratch rows (each padded to 8 sublanes).
    per_lane_bytes = 4 * (2 * (3 * c_pad + 8) + 24)
    cap = max(128, min(max_tile, vmem_budget // per_lane_bytes))
    hw128 = _round_up(hw, 128)
    cap = max(128, min(cap, hw128) // 128 * 128)

    best = 128
    t = cap
    while t >= 128:
        if hw128 % t == 0:
            best = t
            break
        t -= 128
    if best * 4 < cap:
        # Poor divisor structure: pad the pixel axis to a multiple of the cap.
        return cap, _round_up(hw, cap)
    return best, hw128


# ---------------------------------------------------------------------------
# JAX wrappers
# ---------------------------------------------------------------------------
def fused_semantic_terms(logits1, logits2, labels, class_weight):
    """Runs the fused kernel.

    Returns (CE head1, CE head2, lovasz errors (C, P), padded flat labels (P,)).
    """
    N, C, H, W = logits1.shape
    HW = H * W

    # reshape only -- no data movement, no HBM transpose
    x1 = logits1.reshape(N, C, HW)
    x2 = logits2.reshape(N, C, HW)
    y = labels.reshape(N, 1, HW).astype(jnp.int32)
    w = class_weight.astype(jnp.float32).reshape(C, 1)

    vmem_cap = _vmem_capacity_bytes()
    tile_budget = min(int(vmem_cap * 0.60), 80 * 1024 * 1024)   # ~38 MiB on v7x
    vmem_limit = min(int(vmem_cap * 0.80), 100 * 1024 * 1024)

    tile_p, hw_pad = _choose_tiling(HW, C, tile_budget)
    if hw_pad != HW:
        pad = hw_pad - HW
        # padded pixels carry the ignore label -> zero CE weight & zero error
        x1 = jnp.pad(x1, ((0, 0), (0, 0), (0, pad)))
        x2 = jnp.pad(x2, ((0, 0), (0, 0), (0, pad)))
        y = jnp.pad(y, ((0, 0), (0, 0), (0, pad)), constant_values=LOVASZ_IGNORE)
    n_tiles = hw_pad // tile_p
    P = N * hw_pad

    out_shape = (
        jax.ShapeDtypeStruct((C, P), jnp.float32),    # lovasz errors, class-major
        jax.ShapeDtypeStruct((N, 8, 1), jnp.float32), # per-n CE partials (rows 0..2)
    )

    err_map = lambda n, i, nt=n_tiles: (0, n * nt + i)

    errors, partials = pl.pallas_call(
        _fused_semantic_kernel,
        out_shape=out_shape,
        grid_spec=pltpu.PrefetchScalarGridSpec(
            num_scalar_prefetch=0,
            grid=(N, n_tiles),
            in_specs=[
                pl.BlockSpec((None, C, tile_p), lambda n, i: (n, 0, i)),  # head-1 logits
                pl.BlockSpec((None, C, tile_p), lambda n, i: (n, 0, i)),  # head-2 logits
                pl.BlockSpec((None, 1, tile_p), lambda n, i: (n, 0, i)),  # labels
                pl.BlockSpec((C, 1), lambda n, i: (0, 0)),                # class weights
            ],
            out_specs=[
                pl.BlockSpec((C, tile_p), err_map),                       # errors (C, P)
                pl.BlockSpec((None, 8, 1), lambda n, i: (n, 0, 0)),       # per-n partials
            ],
            scratch_shapes=[
                pltpu.VMEM((1, tile_p), jnp.float32),   # CE partials head 1
                pltpu.VMEM((1, tile_p), jnp.float32),   # CE partials head 2
                pltpu.VMEM((1, tile_p), jnp.float32),   # weight partials
            ],
        ),
        compiler_params=pltpu.CompilerParams(
            # batch axis is independent per-n -> megacore-parallel (2 TCs on v7x)
            dimension_semantics=("parallel", "arbitrary"),
            vmem_limit_bytes=vmem_limit),
    )(x1, x2, y, w)

    nll1 = jnp.sum(partials[:, 0, 0])
    nll2 = jnp.sum(partials[:, 1, 0])
    wsum = jnp.sum(partials[:, 2, 0])
    ce1 = nll1 / wsum
    ce2 = nll2 / wsum
    labels_flat = y.reshape(-1)
    return ce1, ce2, errors, labels_flat


def lovasz_from_errors(errors, labels_flat, num_classes):
    """lovasz_softmax_flat(classes='present') from kernel-produced error maps."""
    # TODO(synk): the data-dependent per-class descending sort + cumulative
    # Jaccard gradient have no clean Pallas TPU equivalent; kept as a single
    # key/payload lax.sort (no argsort + double gather) in JAX glue.
    valid = labels_flat != LOVASZ_IGNORE

    def per_class(c, err_c):
        fg_c = jnp.where(valid, labels_flat == c, False).astype(jnp.float32)
        present = jnp.sum(fg_c) > 0
        neg_err_s, fg_s = jax.lax.sort((-err_c, fg_c), num_keys=1)  # desc. by err
        err_s = -neg_err_s
        gts = jnp.sum(fg_s)
        inter = gts - jnp.cumsum(fg_s)
        union = gts + jnp.cumsum(1.0 - fg_s)
        jac = 1.0 - inter / union
        grad = jnp.concatenate([jac[:1], jac[1:] - jac[:-1]])
        return jnp.dot(err_s, grad), present

    losses, presents = jax.vmap(per_class)(jnp.arange(num_classes), errors)
    pmask = presents.astype(jnp.float32)
    cnt = jnp.sum(pmask)
    return jnp.where(cnt > 0, jnp.sum(losses * pmask) / jnp.maximum(cnt, 1.0), 0.0)


def eeemodel_loss(inputs, targets, class_weight_semantic):
    """Forward of eeemodelLoss: CE(sem1) + lovasz(softmax(sem1)) + CE(sem2)."""
    semantic_gt, binary_gt, boundary_gt = targets            # binary/boundary unused
    semantic_out, semantic_out_2, sal_out, edge_out = inputs  # sal/edge unused
    loss1, loss3, errors, labels_flat = fused_semantic_terms(
        semantic_out, semantic_out_2, semantic_gt, class_weight_semantic)
    loss2 = lovasz_from_errors(errors, labels_flat, semantic_out.shape[1])
    return loss1 + loss2 + loss3


# ---------------------------------------------------------------------------
# Pure-JAX reference (mirrors the PyTorch semantics; label 255 is treated as
# ignore in the CE terms, matching the kernel's convention — PyTorch's
# CrossEntropyLoss without ignore_index is undefined for out-of-range labels).
# ---------------------------------------------------------------------------
def _reference_loss(inputs, targets, class_weight):
    semantic_gt, _, _ = targets
    semantic_out, semantic_out_2, _, _ = inputs

    def weighted_ce(logits, labels):
        _, C, _, _ = logits.shape
        lp = jax.nn.log_softmax(logits.astype(jnp.float32), axis=1)
        lp = jnp.transpose(lp, (0, 2, 3, 1)).reshape(-1, C)
        y = labels.reshape(-1)
        valid = y != LOVASZ_IGNORE
        ys = jnp.where(valid, y, 0)
        nll = -jnp.take_along_axis(lp, ys[:, None], axis=1)[:, 0]
        wy = class_weight[ys] * valid.astype(jnp.float32)
        return jnp.sum(nll * wy) / jnp.sum(wy)

    def lovasz(logits, labels):
        _, C, _, _ = logits.shape
        probs = jax.nn.softmax(logits.astype(jnp.float32), axis=1)
        probs = jnp.transpose(probs, (0, 2, 3, 1)).reshape(-1, C)
        y = labels.reshape(-1)
        valid = (y != LOVASZ_IGNORE).astype(jnp.float32)
        losses, presents = [], []
        for c in range(C):
            fg = (y == c).astype(jnp.float32) * valid
            err = jnp.abs(fg - probs[:, c]) * valid
            order = jnp.argsort(-err)
            err_s, fg_s = err[order], fg[order]
            gts = jnp.sum(fg_s)
            inter = gts - jnp.cumsum(fg_s)
            union = gts + jnp.cumsum(1.0 - fg_s)
            jac = 1.0 - inter / union
            grad = jnp.concatenate([jac[:1], jac[1:] - jac[:-1]])
            losses.append(jnp.dot(err_s, grad))
            presents.append(jnp.sum(fg) > 0)
        losses = jnp.stack(losses)
        pm = jnp.stack(presents).astype(jnp.float32)
        cnt = jnp.sum(pm)
        return jnp.where(cnt > 0, jnp.sum(losses * pm) / jnp.maximum(cnt, 1.0), 0.0)

    return (weighted_ce(semantic_out, semantic_gt)
            + lovasz(semantic_out, semantic_gt)
            + weighted_ce(semantic_out_2, semantic_gt))


if __name__ == "__main__":
    def run_case(key, N, C, H, W, with_ignore):
        k1, k2, k3, k4, k5, k6 = jax.random.split(key, 6)
        # inputs = (semantic_out, semantic_out_2, sal_out, edge_out)
        semantic_out = jax.random.normal(k1, (N, C, H, W), jnp.float32)
        semantic_out_2 = jax.random.normal(k2, (N, C, H, W), jnp.float32)
        sal_out = jax.random.normal(k3, (N, 2, H, W), jnp.float32)    # unused
        edge_out = jax.random.normal(k4, (N, 2, H, W), jnp.float32)   # unused
        # targets = (semantic_gt, binary_gt, boundary_gt)
        semantic_gt = jax.random.randint(k5, (N, H, W), 0, C, jnp.int32)
        if with_ignore:
            semantic_gt = semantic_gt.at[:, :2, :3].set(LOVASZ_IGNORE)
        binary_gt = (semantic_gt > 0).astype(jnp.int32)               # unused
        boundary_gt = jnp.zeros((N, H, W), jnp.int32)                 # unused
        # deterministic stand-in for self.class_weight_semantic
        class_weight = 0.5 + jax.random.uniform(k6, (C,), jnp.float32)

        inputs = (semantic_out, semantic_out_2, sal_out, edge_out)
        targets = (semantic_gt, binary_gt, boundary_gt)

        loss = jax.block_until_ready(
            jax.jit(eeemodel_loss)(inputs, targets, class_weight))
        ref = jax.block_until_ready(
            _reference_loss(inputs, targets, class_weight))
        np.testing.assert_allclose(float(loss), float(ref), rtol=2e-3, atol=2e-3)
        return float(loss)

    key = jax.random.PRNGKey(0)
    k_a, k_b = jax.random.split(key)
    run_case(k_a, N=2, C=4, H=16, W=16, with_ignore=False)   # HW % 128 == 0 path
    run_case(k_b, N=1, C=5, H=12, W=12, with_ignore=True)    # padded + ignore-255 path

    print("KERNEL_OK")
</pallas_src>

<mosaic_0001>
module attributes {stable_mosaic.version = 11 : i64} {
  func.func @_fused_semantic_kernel(%arg0: i32, %arg1: i32, %arg2: memref<1x4x256xf32, #tpu.memory_space<vmem>>, %arg3: memref<1x4x256xf32, #tpu.memory_space<vmem>>, %arg4: memref<1x1x256xi32, #tpu.memory_space<vmem>>, %arg5: memref<4x1xf32, #tpu.memory_space<vmem>>, %arg6: memref<4x256xf32, #tpu.memory_space<vmem>>, %arg7: memref<1x8x1xf32, #tpu.memory_space<vmem>>, %arg8: memref<1x256xf32, #tpu.memory_space<vmem>>, %arg9: memref<1x256xf32, #tpu.memory_space<vmem>>, %arg10: memref<1x256xf32, #tpu.memory_space<vmem>>) attributes {dimension_semantics = [#tpu.dimension_semantics<parallel>, #tpu.dimension_semantics<arbitrary>], iteration_bounds = array<i64: 2, 1>, scalar_prefetch = 0 : i64, scratch_operands = 3 : i64, tpu.core_type = #tpu.core_type<tc>, window_params = [{transform_indices = @transform_0, window_bounds = array<i64: 1, 4, 256>}, {transform_indices = @transform_1, window_bounds = array<i64: 1, 4, 256>}, {transform_indices = @transform_2, window_bounds = array<i64: 1, 1, 256>}, {pipeline_mode = #tpu.pipeline_mode<synchronous>, transform_indices = @transform_3, window_bounds = array<i64: 4, 1>}, {transform_indices = @transform_4, window_bounds = array<i64: 4, 256>}, {transform_indices = @transform_5, window_bounds = array<i64: 1, 8, 1>}]} {
    %c0_i32 = arith.constant 0 : i32
    %0 = arith.cmpi eq, %arg1, %c0_i32 : i32
    %c0_i32_0 = arith.constant 0 : i32
    %1 = arith.cmpi eq, %arg1, %c0_i32_0 : i32
    %2 = arith.extui %1 : i1 to i32
    %c0_i32_1 = arith.constant 0 : i32
    %3 = arith.cmpi ne, %2, %c0_i32_1 : i32
    scf.if %3 {
      %cst_35 = arith.constant 0.000000e+00 : f32
      %79 = vector.broadcast %cst_35 : f32 to vector<1x256xf32>
      %c0_36 = arith.constant 0 : index
      %c0_37 = arith.constant 0 : index
      %80 = vector.load %arg8[%c0_36, %c0_37] : memref<1x256xf32, #tpu.memory_space<vmem>>, vector<1x256xf32>
      tpu.vector_store %arg8[%c0_36, %c0_37], %79 {strides = array<i32>} : memref<1x256xf32, #tpu.memory_space<vmem>>, vector<1x256xf32>,
      %cst_38 = arith.constant 0.000000e+00 : f32
      %81 = vector.broadcast %cst_38 : f32 to vector<1x256xf32>
      %c0_39 = arith.constant 0 : index
      %c0_40 = arith.constant 0 : index
      %82 = vector.load %arg9[%c0_39, %c0_40] : memref<1x256xf32, #tpu.memory_space<vmem>>, vector<1x256xf32>
      tpu.vector_store %arg9[%c0_39, %c0_40], %81 {strides = array<i32>} : memref<1x256xf32, #tpu.memory_space<vmem>>, vector<1x256xf32>,
      %cst_41 = arith.constant 0.000000e+00 : f32
      %83 = vector.broadcast %cst_41 : f32 to vector<1x256xf32>
      %c0_42 = arith.constant 0 : index
      %c0_43 = arith.constant 0 : index
      %84 = vector.load %arg10[%c0_42, %c0_43] : memref<1x256xf32, #tpu.memory_space<vmem>>, vector<1x256xf32>
      tpu.vector_store %arg10[%c0_42, %c0_43], %83 {strides = array<i32>} : memref<1x256xf32, #tpu.memory_space<vmem>>, vector<1x256xf32>,
    } else {
    }
    %c0 = arith.constant 0 : index
    %c0_2 = arith.constant 0 : index
    %c0_3 = arith.constant 0 : index
    %4 = vector.load %arg2[%c0, %c0_2, %c0_3] : memref<1x4x256xf32, #tpu.memory_space<vmem>>, vector<1x4x256xf32>
    %5 = vector.shape_cast %4 : vector<1x4x256xf32> to vector<4x256xf32>
    %c0_4 = arith.constant 0 : index
    %c0_5 = arith.constant 0 : index
    %c0_6 = arith.constant 0 : index
    %6 = vector.load %arg3[%c0_4, %c0_5, %c0_6] : memref<1x4x256xf32, #tpu.memory_space<vmem>>, vector<1x4x256xf32>
    %7 = vector.shape_cast %6 : vector<1x4x256xf32> to vector<4x256xf32>
    %c0_7 = arith.constant 0 : index
    %c0_8 = arith.constant 0 : index
    %c0_9 = arith.constant 0 : index
    %8 = vector.load %arg4[%c0_7, %c0_8, %c0_9] : memref<1x1x256xi32, #tpu.memory_space<vmem>>, vector<1x1x256xi32>
    %9 = vector.shape_cast %8 : vector<1x1x256xi32> to vector<1x256xi32>
    %c0_10 = arith.constant 0 : index
    %c0_11 = arith.constant 0 : index
    %10 = vector.load %arg5[%c0_10, %c0_11] : memref<4x1xf32, #tpu.memory_space<vmem>>, vector<4x1xf32>
    %11 = tpu.iota {dimensions = array<i32: 0>} : vector<4x256xi32>
    %12 = vector.broadcast %9 : vector<1x256xi32> to vector<4x256xi32>
    %13 = arith.cmpi eq, %11, %12 : vector<4x256xi32>
    %14 = arith.extui %13 : vector<4x256xi1> to vector<4x256xi32>
    %15 = arith.sitofp %14 : vector<4x256xi32> to vector<4x256xf32>
    %16 = vector.broadcast %10 : vector<4x1xf32> to vector<4x256xf32>
    %17 = arith.mulf %15, %16 : vector<4x256xf32>
    %cst = arith.constant dense<0xFF800000> : vector<256xf32>
    %18 = vector.multi_reduction <maximumf>, %5, %cst [0] : vector<4x256xf32> to vector<256xf32>
    %19 = vector.shape_cast %18 : vector<256xf32> to vector<1x256xf32>
    %20 = vector.broadcast %19 : vector<1x256xf32> to vector<4x256xf32>
    %21 = arith.subf %5, %20 : vector<4x256xf32>
    %22 = math.exp %21 : vector<4x256xf32>
    %cst_12 = arith.constant dense<0.000000e+00> : vector<256xf32>
    %23 = vector.multi_reduction <add>, %22, %cst_12 [0] : vector<4x256xf32> to vector<256xf32>
    %24 = vector.shape_cast %23 : vector<256xf32> to vector<1x256xf32>
    %25 = vector.broadcast %19 : vector<1x256xf32> to vector<4x256xf32>
    %26 = arith.subf %5, %25 : vector<4x256xf32>
    %27 = math.log %24 : vector<1x256xf32>
    %28 = vector.broadcast %27 : vector<1x256xf32> to vector<4x256xf32>
    %29 = arith.subf %26, %28 : vector<4x256xf32>
    %30 = tpu.reciprocal %24 {approx = true} : vector<1x256xf32> -> vector<1x256xf32>
    %31 = vector.broadcast %30 : vector<1x256xf32> to vector<4x256xf32>
    %32 = arith.mulf %22, %31 : vector<4x256xf32>
    %cst_13 = arith.constant dense<0xFF800000> : vector<256xf32>
    %33 = vector.multi_reduction <maximumf>, %7, %cst_13 [0] : vector<4x256xf32> to vector<256xf32>
    %34 = vector.shape_cast %33 : vector<256xf32> to vector<1x256xf32>
    %35 = vector.broadcast %34 : vector<1x256xf32> to vector<4x256xf32>
    %36 = arith.subf %7, %35 : vector<4x256xf32>
    %37 = vector.broadcast %34 : vector<1x256xf32> to vector<4x256xf32>
    %38 = arith.subf %7, %37 : vector<4x256xf32>
    %39 = math.exp %38 : vector<4x256xf32>
    %cst_14 = arith.constant dense<0.000000e+00> : vector<256xf32>
    %40 = vector.multi_reduction <add>, %39, %cst_14 [0] : vector<4x256xf32> to vector<256xf32>
    %41 = vector.shape_cast %40 : vector<256xf32> to vector<1x256xf32>
    %42 = math.log %41 : vector<1x256xf32>
    %43 = vector.broadcast %42 : vector<1x256xf32> to vector<4x256xf32>
    %44 = arith.subf %36, %43 : vector<4x256xf32>
    %c0_15 = arith.constant 0 : index
    %c0_16 = arith.constant 0 : index
    %45 = vector.load %arg8[%c0_15, %c0_16] : memref<1x256xf32, #tpu.memory_space<vmem>>, vector<1x256xf32>
    %46 = arith.mulf %17, %29 : vector<4x256xf32>
    %cst_17 = arith.constant dense<0.000000e+00> : vector<256xf32>
    %47 = vector.multi_reduction <add>, %46, %cst_17 [0] : vector<4x256xf32> to vector<256xf32>
    %48 = vector.shape_cast %47 : vector<256xf32> to vector<1x256xf32>
    %cst_18 = arith.constant 0.000000e+00 : f32
    %49 = vector.broadcast %cst_18 : f32 to vector<1x256xf32>
    %50 = arith.subf %49, %48 : vector<1x256xf32>
    %51 = arith.addf %45, %50 : vector<1x256xf32>
    %c0_19 = arith.constant 0 : index
    %c0_20 = arith.constant 0 : index
    %52 = vector.load %arg8[%c0_19, %c0_20] : memref<1x256xf32, #tpu.memory_space<vmem>>, vector<1x256xf32>
    tpu.vector_store %arg8[%c0_19, %c0_20], %51 {strides = array<i32>} : memref<1x256xf32, #tpu.memory_space<vmem>>, vector<1x256xf32>,
    %c0_21 = arith.constant 0 : index
    %c0_22 = arith.constant 0 : index
    %53 = vector.load %arg9[%c0_21, %c0_22] : memref<1x256xf32, #tpu.memory_space<vmem>>, vector<1x256xf32>
    %54 = arith.mulf %17, %44 : vector<4x256xf32>
    %cst_23 = arith.constant dense<0.000000e+00> : vector<256xf32>
    %55 = vector.multi_reduction <add>, %54, %cst_23 [0] : vector<4x256xf32> to vector<256xf32>
    %56 = vector.shape_cast %55 : vector<256xf32> to vector<1x256xf32>
    %cst_24 = arith.constant 0.000000e+00 : f32
    %57 = vector.broadcast %cst_24 : f32 to vector<1x256xf32>
    %58 = arith.subf %57, %56 : vector<1x256xf32>
    %59 = arith.addf %53, %58 : vector<1x256xf32>
    %c0_25 = arith.constant 0 : index
    %c0_26 = arith.constant 0 : index
    %60 = vector.load %arg9[%c0_25, %c0_26] : memref<1x256xf32, #tpu.memory_space<vmem>>, vector<1x256xf32>
    tpu.vector_store %arg9[%c0_25, %c0_26], %59 {strides = array<i32>} : memref<1x256xf32, #tpu.memory_space<vmem>>, vector<1x256xf32>,
    %c0_27 = arith.constant 0 : index
    %c0_28 = arith.constant 0 : index
    %61 = vector.load %arg10[%c0_27, %c0_28] : memref<1x256xf32, #tpu.memory_space<vmem>>, vector<1x256xf32>
    %cst_29 = arith.constant dense<0.000000e+00> : vector<256xf32>
    %62 = vector.multi_reduction <add>, %17, %cst_29 [0] : vector<4x256xf32> to vector<256xf32>
    %63 = vector.shape_cast %62 : vector<256xf32> to vector<1x256xf32>
    %64 = arith.addf %61, %63 : vector<1x256xf32>
    %c0_30 = arith.constant 0 : index
    %c0_31 = arith.constant 0 : index
    %65 = vector.load %arg10[%c0_30, %c0_31] : memref<1x256xf32, #tpu.memory_space<vmem>>, vector<1x256xf32>
    tpu.vector_store %arg10[%c0_30, %c0_31], %64 {strides = array<i32>} : memref<1x256xf32, #tpu.memory_space<vmem>>, vector<1x256xf32>,
    %c255_i32 = arith.constant 255 : i32
    %66 = vector.broadcast %c255_i32 : i32 to vector<1x256xi32>
    %67 = arith.cmpi ne, %9, %66 : vector<1x256xi32>
    %68 = arith.extui %67 : vector<1x256xi1> to vector<1x256xi32>
    %69 = arith.sitofp %68 : vector<1x256xi32> to vector<1x256xf32>
    %70 = vector.broadcast %69 : vector<1x256xf32> to vector<4x256xf32>
    %71 = arith.mulf %15, %70 : vector<4x256xf32>
    %72 = arith.subf %71, %32 : vector<4x256xf32>
    %73 = math.absf %72 : vector<4x256xf32>
    %74 = vector.broadcast %69 : vector<1x256xf32> to vector<4x256xf32>
    %75 = arith.mulf %73, %74 : vector<4x256xf32>
    %c0_32 = arith.constant 0 : index
    %c0_33 = arith.constant 0 : index
    %76 = vector.load %arg6[%c0_32, %c0_33] : memref<4x256xf32, #tpu.memory_space<vmem>>, vector<4x256xf32>
    tpu.vector_store %arg6[%c0_32, %c0_33], %75 {strides = array<i32>} : memref<4x256xf32, #tpu.memory_space<vmem>>, vector<4x256xf32>,
    %77 = arith.extui %0 : i1 to i32
    %c0_i32_34 = arith.constant 0 : i32
    %78 = arith.cmpi ne, %77, %c0_i32_34 : i32
    scf.if %78 {
      %c0_35 = arith.constant 0 : index
      %c0_36 = arith.constant 0 : index
      %79 = vector.load %arg8[%c0_35, %c0_36] : memref<1x256xf32, #tpu.memory_space<vmem>>, vector<1x256xf32>
      %80 = vector.shape_cast %79 : vector<1x256xf32> to vector<1x1x256xf32>
      %cst_37 = arith.constant dense<0.000000e+00> : vector<1xf32>
      %81 = vector.multi_reduction <add>, %80, %cst_37 [1, 2] : vector<1x1x256xf32> to vector<1xf32>
      %82 = vector.shape_cast %81 : vector<1xf32> to vector<1x1x1xf32>
      %83 = vector.extract %82[0, 0, 0] : f32 from vector<1x1x1xf32>
      %84 = vector.broadcast %83 : f32 to vector<1x1xf32>
      %c0_38 = arith.constant 0 : index
      %c0_39 = arith.constant 0 : index
      %85 = vector.load %arg9[%c0_38, %c0_39] : memref<1x256xf32, #tpu.memory_space<vmem>>, vector<1x256xf32>
      %86 = vector.shape_cast %85 : vector<1x256xf32> to vector<1x1x256xf32>
      %cst_40 = arith.constant dense<0.000000e+00> : vector<1xf32>
      %87 = vector.multi_reduction <add>, %86, %cst_40 [1, 2] : vector<1x1x256xf32> to vector<1xf32>
      %88 = vector.shape_cast %87 : vector<1xf32> to vector<1x1x1xf32>
      %89 = vector.extract %88[0, 0, 0] : f32 from vector<1x1x1xf32>
      %90 = vector.broadcast %89 : f32 to vector<1x1xf32>
      %c0_41 = arith.constant 0 : index
      %c0_42 = arith.constant 0 : index
      %91 = vector.load %arg10[%c0_41, %c0_42] : memref<1x256xf32, #tpu.memory_space<vmem>>, vector<1x256xf32>
      %92 = vector.shape_cast %91 : vector<1x256xf32> to vector<1x1x256xf32>
      %cst_43 = arith.constant dense<0.000000e+00> : vector<1xf32>
      %93 = vector.multi_reduction <add>, %92, %cst_43 [1, 2] : vector<1x1x256xf32> to vector<1xf32>
      %94 = vector.shape_cast %93 : vector<1xf32> to vector<1x1x1xf32>
      %95 = vector.extract %94[0, 0, 0] : f32 from vector<1x1x1xf32>
      %96 = vector.broadcast %95 : f32 to vector<1x1xf32>
      %97 = tpu.iota {dimensions = array<i32: 0>} : vector<8x1xi32>
      %c0_i32_44 = arith.constant 0 : i32
      %98 = vector.broadcast %c0_i32_44 : i32 to vector<8x1xi32>
      %99 = arith.cmpi eq, %97, %98 : vector<8x1xi32>
      %c1_i32 = arith.constant 1 : i32
      %100 = vector.broadcast %c1_i32 : i32 to vector<8x1xi32>
      %101 = arith.cmpi eq, %97, %100 : vector<8x1xi32>
      %c2_i32 = arith.constant 2 : i32
      %102 = vector.broadcast %c2_i32 : i32 to vector<8x1xi32>
      %103 = arith.cmpi eq, %97, %102 : vector<8x1xi32>
      %cst_45 = arith.constant 0.000000e+00 : f32
      %104 = vector.shape_cast %96 : vector<1x1xf32> to vector<1x1xf32>
      %105 = vector.broadcast %104 : vector<1x1xf32> to vector<8x1xf32>
      %106 = vector.broadcast %cst_45 : f32 to vector<8x1xf32>
      %107 = arith.select %103, %105, %106 : vector<8x1xi1>, vector<8x1xf32>
      %108 = vector.shape_cast %90 : vector<1x1xf32> to vector<1x1xf32>
      %109 = vector.broadcast %108 : vector<1x1xf32> to vector<8x1xf32>
      %110 = arith.select %101, %109, %107 : vector<8x1xi1>, vector<8x1xf32>
      %111 = vector.shape_cast %84 : vector<1x1xf32> to vector<1x1xf32>
      %112 = vector.broadcast %111 : vector<1x1xf32> to vector<8x1xf32>
      %113 = arith.select %99, %112, %110 : vector<8x1xi1>, vector<8x1xf32>
      %c0_46 = arith.constant 0 : index
      %c0_47 = arith.constant 0 : index
      %c0_48 = arith.constant 0 : index
      %114 = vector.load %arg7[%c0_46, %c0_47, %c0_48] : memref<1x8x1xf32, #tpu.memory_space<vmem>>, vector<1x8x1xf32>
      %115 = vector.shape_cast %114 : vector<1x8x1xf32> to vector<8x1xf32>
      %116 = vector.shape_cast %113 : vector<8x1xf32> to vector<1x8x1xf32>
      tpu.vector_store %arg7[%c0_46, %c0_47, %c0_48], %116 {strides = array<i32>} : memref<1x8x1xf32, #tpu.memory_space<vmem>>, vector<1x8x1xf32>,
    } else {
    }
    return
  }
  func.func @transform_0(%arg0: i32, %arg1: i32) -> (i32, i32, i32) {
    %c0_i32 = arith.constant 0 : i32
    %c0_i32_0 = arith.constant 0 : i32
    return %arg0, %c0_i32, %arg1 : i32, i32, i32
  }
  func.func @transform_1(%arg0: i32, %arg1: i32) -> (i32, i32, i32) {
    %c0_i32 = arith.constant 0 : i32
    %c0_i32_0 = arith.constant 0 : i32
    return %arg0, %c0_i32, %arg1 : i32, i32, i32
  }
  func.func @transform_2(%arg0: i32, %arg1: i32) -> (i32, i32, i32) {
    %c0_i32 = arith.constant 0 : i32
    %c0_i32_0 = arith.constant 0 : i32
    return %arg0, %c0_i32, %arg1 : i32, i32, i32
  }
  func.func @transform_3(%arg0: i32, %arg1: i32) -> (i32, i32) {
    %c0_i32 = arith.constant 0 : i32
    %c0_i32_0 = arith.constant 0 : i32
    %c0_i32_1 = arith.constant 0 : i32
    return %c0_i32, %c0_i32_0 : i32, i32
  }
  func.func @transform_4(%arg0: i32, %arg1: i32) -> (i32, i32) {
    %c1_i32 = arith.constant 1 : i32
    %0 = arith.muli %arg0, %c1_i32 : i32
    %1 = arith.addi %0, %arg1 : i32
    %c0_i32 = arith.constant 0 : i32
    %c0_i32_0 = arith.constant 0 : i32
    return %c0_i32, %1 : i32, i32
  }
  func.func @transform_5(%arg0: i32, %arg1: i32) -> (i32, i32, i32) {
    %c0_i32 = arith.constant 0 : i32
    %c0_i32_0 = arith.constant 0 : i32
    %c0_i32_1 = arith.constant 0 : i32
    return %arg0, %c0_i32, %c0_i32_0 : i32, i32, i32
  }
}

</mosaic_0001>

<bundles_post_ra>
// kernel: neg.2
= control target key start
LH: loop header
LB: loop body
LE: loop exit
PB: predicated region body
PF: predicated region fallthrough
CT: control target
= control target key end

     0   :  { %s72_s0 = inlined_call_operand.vmem [shape: f32[4,512], index: 0, kind: input, shape index: {}]   ;;  %s73_s1 = inlined_call_operand.vmem [shape: f32[4,512], index: 1, kind: output, shape index: {}]  }
   0x1   :  { %v2_v0 = vld [vmem:[%s72_s0] sm:$0xf]  ;;  %v32_v1 = vld [vmem:[%s72_s0 + $0x4] sm:$0xf]  ;;  %v34_v2 = vld [vmem:[%s72_s0 + $0x8] sm:$0xf] }
   0x2   :  { %v5_v3 = vxor.u32 2147483648, %v2_v0  ;;  %v12_v4 = vxor.u32 2147483648, %v32_v1  ;;  %v20_v5 = vxor.u32 2147483648, %v34_v2  ;;  %v36_v6 = vld [vmem:[%s72_s0 + $0xc] sm:$0xf] }
   0x3   :  { %v28_v7 = vxor.u32 2147483648, %v36_v6 }
   0x4   :  { %7 = vst [vmem:[%s73_s1] sm:$0xf] %v5_v3  ;;  %33 = vst [vmem:[%s73_s1 + $0x4] sm:$0xf] %v12_v4 }
   0x5   :  { %35 = vst [vmem:[%s73_s1 + $0x8] sm:$0xf] %v20_v5  ;;  %37 = vst [vmem:[%s73_s1 + $0xc] sm:$0xf] %v28_v7 }

// kernel: eeemodel_loss.1
= control target key start
LH: loop header
LB: loop body
LE: loop exit
PB: predicated region body
PF: predicated region fallthrough
CT: control target
= control target key end

     0   :  { %s992_s18 = smov 0   ;;  %s994_s19 = smov 0   ;;  %s1117_s0 = inlined_call_operand.vmem [shape: f32[2,4,256], index: 0, kind: input, shape index: {}]   ;;  %s1118_s1 = inlined_call_operand.vmem [shape: f32[2,4,256], index: 1, kind: input, shape index: {}]   ;;  %s1119_s2 = inlined_call_operand.vmem [shape: s32[2,1,256], index: 2, kind: input, shape index: {}]   ;;  %s1120_s3 = inlined_call_operand.vmem [shape: f32[4,1], index: 3, kind: input, shape index: {}]   ;;  %s1121_s4 = inlined_call_operand.vmem [shape: f32[4,512], index: 4, kind: output, shape index: {0}]   ;;  %s1122_s5 = inlined_call_operand.vmem [shape: f32[2,8,1], index: 5, kind: output, shape index: {1}]  }
   0x1   :  { %s996_s20 = smov 0  }
   0x2 LB: > { %s28_s21 = sadd.s32 1, %s953_s19  ;;  %p867_p0 = scmp.ge.s32.totalorder %s957_s20, 1  ;;  %s957_s20 = sphi %s996_s20, %s16_s20   ;;  %s953_s19 = sphi %s994_s19, %s1126_s19   ;;  %s949_s18 = sphi %s992_s18, %s1125_s18  }
   0x3   : > { %p30_p1 = scmp.ge.s32.totalorder %s28_s21, 2  ;;  %p244_p2 = scmp.lt.s32.totalorder %s957_s20, 3 }
   0x5   : > { %s1128_s21 = smov (%p30_p1, %s28_s21), 0  ;;  %p245_p3 = pnand %p867_p0, %p244_p2 }
   0x6   : > { %p299_p4 = scmp.lt.s32.totalorder (!%p245_p3), %s949_s18, 1  ;;  %s873_s11 = sshll.u32 (!%p245_p3), %s949_s18, 1 }
   0x7   : > { %248 = sbr.rel (%p245_p3) target bundleno = 387 (0x183), region = 36  ;;  %p329_p5 = scmp.lt.s32.totalorder (!%p245_p3), %s873_s11, 3 }
   0xc   : > { %v353_v0 = vld [vmem:[%s1120_s3] sm:$0xf]  ;;  %v343_v1 = vlaneseq  ;;  %v959_v2 = vmov 0   ;;  %s300_s24 = scalar_select %p299_p4, %s949_s18, 1  ;;  %v960_v5 = vmov 0.0   ;;  %vm380_vm1 = vcmask 1043456  }
   0xd   : > { %916 = vset.pattern.permute.xlu0 %v959_v2  ;;  %s1130_s11 = smov (!%p329_p5, %s873_s11), 3  ;;  %vm653_vm5 = vcmask 1040384   ;;  %vm723_vm9 = vcmask 7168  }
   0xe   : > { %372 = vperm.xlu0 %916, %v353_v0   ;;  %vm1016_vm0 = vcmp.lt.s32.totalorder %v343_v1, 256  ;;  %v1020_v4 = vshrl.u32 %v343_v1, 7  ;;  %s1029_s25 = sshll.u32 %s300_s24, 3  ;;  %s872_s26 = sshll.u32 %s300_s24, 1 }
   0xf   : > { %347 = vst.msk [vmem:[#allocation2] sm:$0x3] %vm1016_vm0, %v960_v5  ;;  %348 = vst.msk [vmem:[#allocation3] sm:$0x3] %vm1016_vm0, %v960_v5  ;;  %s306_s29 = scalar_lea.vmem %s1117_s0, %s1029_s25  ;;  %s316_s7 = scalar_lea.vmem %s1118_s1, %s1029_s25 }
  0x10   : > { %349 = vst.msk [vmem:[#allocation4] sm:$0x3] %vm1016_vm0, %v960_v5  ;;  %v1032_v6 = vsub.s32 0, %v1020_v4  ;;  %v1035_v7 = vsub.s32 1, %v1020_v4  ;;  %s325_s10 = scalar_lea.vmem %s1119_s2, %s872_s26  ;;  %v350_v8 = vld [vmem:[%s306_s29] sm:$0xff]  ;;  %s874_s12 = sshll.u32 %s1130_s11, 2 }
  0x11   : > { %v351_v9 = vld [vmem:[%s316_s7] sm:$0xff]  ;;  %v378_v11 = vcombine.high %v350_v8, %v350_v8  ;;  %v381_v12 = vsel %vm380_vm1, %v350_v8, -inf  ;;  %s332_s15 = scalar_lea.vmem %s1121_s4, %s874_s12  ;;  %vm716_vm6 = vcmp.eq.s32.totalorder %v1020_v4, 2  ;;  %vm715_vm7 = vcmp.eq.s32.totalorder %v1020_v4, 1  ;;  %s338_s24 = scalar_lea.vmem %s1122_s5, %s1029_s25 }
  0x12   : > { %v352_v10 = vld [vmem:[%s325_s10] sm:$0x3]  ;;  %v436_v13 = vcombine.high %v351_v9, %v351_v9  ;;  %v382_v16 = vrot.slane %v381_v12, 4  ;;  %v438_v17 = vsel %vm380_vm1, %v351_v9, -inf  ;;  %vm714_vm8 = vcmp.eq.s32.totalorder %v1020_v4, 0 }
  0x13   : > { %v359_v14 = vrot.slane %v352_v10, %v1032_v6  ;;  %v363_v15 = vrot.slane %v352_v10, %v1035_v7  ;;  %v388_v18 = vsel %vm380_vm1, %v378_v11, -inf  ;;  %v439_v24 = vrot.slane %v438_v17, 4 }
  0x14   : > { %v445_v19 = vsel %vm380_vm1, %v436_v13, -inf  ;;  %v383_v20 = vmax.f32 %v381_v12, %v382_v16  ;;  %v389_v21 = vrot.slane %v388_v18, 4  ;;  %vm608_vm4 = vcmp.ne.s32.totalorder %v352_v10, 255 }
  0x15   : > { %vm364_vm2 = vcmp.eq.s32.totalorder %v1020_v4, %v359_v14  ;;  %vm365_vm3 = vcmp.eq.s32.totalorder %v1020_v4, %v363_v15  ;;  %v446_v27 = vrot.slane %v445_v19, 4  ;;  %v440_v30 = vmax.f32 %v438_v17, %v439_v24 }
  0x16   : > { %v1056_v22 = vsel %vm364_vm2, 1.0, %v960_v5  ;;  %v1058_v23 = vsel %vm365_vm3, 1.0, %v960_v5  ;;  %v384_v25 = vrot.slane %v383_v20, 2  ;;  %v390_v26 = vmax.f32 %v388_v18, %v389_v21 }
  0x17   : > { %v447_v33 = vmax.f32 %v445_v19, %v446_v27  ;;  %v441_v36 = vrot.slane %v440_v30, 2  ;;  %v878_v43 = vsel %vm608_vm4, 1.0, %v960_v5 }
  0x18   : > { %v385_v28 = vmax.f32 %v383_v20, %v384_v25  ;;  %v391_v29 = vrot.slane %v390_v26, 2  ;;  %v615_v45 = vrot.slane %v878_v43, %v1032_v6  ;;  %v619_v46 = vrot.slane %v878_v43, %v1035_v7 }
  0x19   : > { %v448_v38 = vrot.slane %v447_v33, 2  ;;  %v442_v40 = vmax.f32 %v440_v30, %v441_v36 }
  0x1a   : > { %v386_v31 = vrot.slane %v385_v28, 1  ;;  %v392_v32 = vmax.f32 %v390_v26, %v391_v29  ;;  %v622_v49 = vmul.f32 %v1056_v22, %v615_v45  ;;  %v623_v50 = vmul.f32 %v1058_v23, %v619_v46 }
  0x1b   : > { %v449_v42 = vmax.f32 %v447_v33, %v448_v38  ;;  %v443_v47 = vrot.slane %v442_v40, 1 }
  0x1c   : > { %v387_v34 = vmax.f32 %v385_v28, %v386_v31  ;;  %v393_v35 = vrot.slane %v392_v32, 1 }
  0x1d   : > { %v450_v48 = vrot.slane %v449_v42, 1  ;;  %v444_v51 = vmax.f32 %v442_v40, %v443_v47 }
  0x1e   : > { %v394_v37 = vmax.f32 %v392_v32, %v393_v35 }
  0x1f   : > { %v451_v52 = vmax.f32 %v449_v42, %v450_v48 }
  0x20   : > { %v397_v39 = vcombine.low %v387_v34, %v394_v37 }
  0x21   : > { %v454_v53 = vcombine.low %v444_v51, %v451_v52 }
  0x22   : > { %v1060_v41 = vsub.f32 %v350_v8, %v397_v39 }
  0x23   : > { %v1067_v54 = vsub.f32 %v351_v9, %v454_v53 }
  0x24   : > { %v400_v44 = vmul.f32 1.442695, %v1060_v41 }
  0x25   : > { %v457_v60 = vmul.f32 1.442695, %v1067_v54 }
  0x26   : > { %919 = vpow2.f32 %v400_v44 }
  0x27   : > { %921 = vpow2.f32 %v457_v60 }
  0x33   : > { %v920_v55 = vpop.eup %919 }
  0x34   : > { %v403_v56 = vcombine.high %v920_v55, %v920_v55  ;;  %v405_v57 = vsel %vm380_vm1, %v920_v55, 0.0  ;;  %v922_v12 = vpop.eup %921 }
  0x35   : > { %v406_v58 = vrot.slane %v405_v57, 4  ;;  %v460_v13 = vcombine.high %v922_v12, %v922_v12  ;;  %v462_v14 = vsel %vm380_vm1, %v922_v12, 0.0 }
  0x36   : > { %v412_v59 = vsel %vm380_vm1, %v403_v56, 0.0  ;;  %v463_v17 = vrot.slane %v462_v14, 4 }
  0x37   : > { %v407_v61 = vadd.f32 %v406_v58, %v405_v57  ;;  %v413_v62 = vrot.slane %v412_v59, 4  ;;  %v469_v15 = vsel %vm380_vm1, %v460_v13, 0.0 }
  0x38   : > { %v470_v19 = vrot.slane %v469_v15, 4  ;;  %v464_v24 = vadd.f32 %v463_v17, %v462_v14  ;;  %v961_v17 = vmov 1966171168  }
  0x39   : > { %v408_v63 = vrot.slane %v407_v61, 2  ;;  %v414_v0 = vadd.f32 %v413_v62, %v412_v59 }
  0x3a   : > { %v471_v25 = vadd.f32 %v470_v19, %v469_v15  ;;  %v465_v28 = vrot.slane %v464_v24, 2 }
  0x3b   : > { %v409_v1 = vadd.f32 %v408_v63, %v407_v61  ;;  %v415_v2 = vrot.slane %v414_v0, 2 }
  0x3c   : > { %v472_v31 = vrot.slane %v471_v25, 2  ;;  %v466_v34 = vadd.f32 %v465_v28, %v464_v24 }
  0x3d   : > { %v410_v5 = vrot.slane %v409_v1, 1  ;;  %v416_v8 = vadd.f32 %v415_v2, %v414_v0 }
  0x3e   : > { %v473_v36 = vadd.f32 %v472_v31, %v471_v25  ;;  %v467_v38 = vrot.slane %v466_v34, 1 }
  0x3f   : > { %v417_v9 = vrot.slane %v416_v8, 1  ;;  %v411_v10 = vadd.f32 %v410_v5, %v409_v1 }
  0x40   : > { %v474_v39 = vrot.slane %v473_v36, 1  ;;  %v468_v40 = vadd.f32 %v467_v38, %v466_v34 }
  0x41   : > { %v418_v11 = vadd.f32 %v417_v9, %v416_v8  ;;  %923 = vrcp.f32 %v411_v10 }
  0x42   : > { %v475_v42 = vadd.f32 %v474_v39, %v473_v36 }
  0x43   : > { %925 = vrcp.f32 %v418_v11 }
  0x44   : > { %927 = vlog2.f32 %v411_v10 }
  0x45   : > { %929 = vlog2.f32 %v418_v11 }
  0x46   : > { %931 = vlog2.f32 %v468_v40 }
  0x47   : > { %933 = vlog2.f32 %v475_v42 }
  0x4e   : > { %v924_v16 = vpop.eup %923 }
  0x50   : > { %v926_v18 = vpop.eup %925 }
  0x51   : > { %v432_v20 = vcombine.low %v924_v16, %v926_v18  ;;  %v928_v43 = vpop.eup %927  ;;  %v511_v18 = vunpack.c.l.s4 %v961_v17 }
  0x52   : > { %v930_v44 = vpop.eup %929 }
  0x53   : > { %v434_v21 = vmul.f32 %v920_v55, %v432_v20  ;;  %v422_v48 = vmul.f32 0.6931472, %v930_v44 }
  0x55   : > { %v625_v26 = vcombine.high %v434_v21, %v434_v21  ;;  %v627_v27 = vsub.f32 %v622_v49, %v434_v21 }
  0x57   : > { %v628_v29 = vsub.f32 %v623_v50, %v625_v26  ;;  %v629_v30 = vand.u32 2147483647, %v627_v27 }
  0x59   : > { %v630_v32 = vand.u32 2147483647, %v628_v29  ;;  %v631_v33 = vmul.f32 %v629_v30, %v615_v45  ;;  %v932_v45 = vpop.eup %931 }
  0x5a   : > { %v934_v47 = vpop.eup %933  ;;  %v477_v49 = vmul.f32 0.6931472, %v932_v45 }
  0x5b   : > { %v632_v35 = vmul.f32 %v630_v32, %v619_v46  ;;  %v420_v46 = vmul.f32 0.6931472, %v928_v43  ;;  %v479_v50 = vmul.f32 0.6931472, %v934_v47 }
  0x5d   : > { %v635_v37 = vcombine.low %v631_v33, %v632_v35  ;;  %v425_v51 = vcombine.low %v420_v46, %v422_v48  ;;  %v482_v52 = vcombine.low %v477_v49, %v479_v50  ;;  %v512_v33 = vunpack.c.0.s8 %v511_v18 }
  0x5f   : > { %637 = vst [vmem:[%s332_s15] sm:$0xff] %v635_v37  ;;  %v427_v53 = vsub.f32 %v1060_v41, %v425_v51  ;;  %v484_v55 = vsub.f32 %v1067_v54, %v482_v52  ;;  %v515_v46 = vsub.s32 %v512_v33, %v1020_v4 }
  0x61   : > { %v487_v56 = vcombine.high %v427_v53, %v427_v53  ;;  %v533_v57 = vcombine.high %v484_v55, %v484_v55 }
  0x89   : > { %v373_v58 = vpop.permute.xlu0 %372 }
  0x8a   : > { %v375_v59 = vmul.f32 %v1056_v22, %v373_v58  ;;  %v376_v60 = vmul.f32 %v1058_v23, %v373_v58 }
  0x8c   : > { %v489_v61 = vmul.f32 %v427_v53, %v375_v59  ;;  %v490_v62 = vmul.f32 %v487_v56, %v376_v60  ;;  %v535_v63 = vmul.f32 %v484_v55, %v375_v59  ;;  %v536_v0 = vmul.f32 %v533_v57, %v376_v60 }
  0x8d   : > { %v574_v1 = vsel %vm380_vm1, %v375_v59, 0.0  ;;  %v581_v2 = vsel %vm380_vm1, %v376_v60, 0.0 }
  0x8e   : > { %v491_v5 = vsel %vm380_vm1, %v489_v61, 0.0  ;;  %v498_v41 = vsel %vm380_vm1, %v490_v62, 0.0  ;;  %v537_v54 = vsel %vm380_vm1, %v535_v63, 0.0  ;;  %v544_v8 = vsel %vm380_vm1, %v536_v0, 0.0  ;;  %v573_v61 = vld [vmem:[#allocation4] sm:$0x3] }
  0x8f   : > { %v492_v9 = vrot.slane %v491_v5, 4  ;;  %v499_v22 = vrot.slane %v498_v41, 4  ;;  %v538_v10 = vrot.slane %v537_v54, 4  ;;  %v545_v23 = vrot.slane %v544_v8, 4  ;;  %v485_v62 = vld [vmem:[#allocation2] sm:$0x3] }
  0x90   : > { %v575_v11 = vrot.slane %v574_v1, 4  ;;  %v582_v12 = vrot.slane %v581_v2, 4  ;;  %v531_v63 = vld [vmem:[#allocation3] sm:$0x3] }
  0x91   : > { %v493_v13 = vadd.f32 %v492_v9, %v491_v5  ;;  %v500_v14 = vadd.f32 %v499_v22, %v498_v41  ;;  %v539_v15 = vadd.f32 %v538_v10, %v537_v54  ;;  %v546_v16 = vadd.f32 %v545_v23, %v544_v8 }
  0x92   : > { %v576_v19 = vadd.f32 %v575_v11, %v574_v1  ;;  %v583_v20 = vadd.f32 %v582_v12, %v581_v2 }
  0x93   : > { %v494_v21 = vrot.slane %v493_v13, 2  ;;  %v501_v24 = vrot.slane %v500_v14, 2  ;;  %v540_v25 = vrot.slane %v539_v15, 2  ;;  %v547_v26 = vrot.slane %v546_v16, 2 }
  0x94   : > { %v577_v27 = vrot.slane %v576_v19, 2  ;;  %v584_v28 = vrot.slane %v583_v20, 2 }
  0x95   : > { %v495_v29 = vadd.f32 %v494_v21, %v493_v13  ;;  %v502_v30 = vadd.f32 %v501_v24, %v500_v14  ;;  %v541_v31 = vadd.f32 %v540_v25, %v539_v15  ;;  %v548_v32 = vadd.f32 %v547_v26, %v546_v16 }
  0x96   : > { %v578_v34 = vadd.f32 %v577_v27, %v576_v19  ;;  %v585_v35 = vadd.f32 %v584_v28, %v583_v20 }
  0x97   : > { %v496_v36 = vrot.slane %v495_v29, 1  ;;  %v503_v37 = vrot.slane %v502_v30, 1  ;;  %v542_v38 = vrot.slane %v541_v31, 1  ;;  %v549_v39 = vrot.slane %v548_v32, 1 }
  0x98   : > { %v579_v40 = vrot.slane %v578_v34, 1  ;;  %v586_v42 = vrot.slane %v585_v35, 1 }
  0x99   : > { %v497_v43 = vadd.f32 %v496_v36, %v495_v29  ;;  %v504_v44 = vadd.f32 %v503_v37, %v502_v30  ;;  %v543_v45 = vadd.f32 %v542_v38, %v541_v31  ;;  %v550_v47 = vadd.f32 %v549_v39, %v548_v32 }
  0x9a   : > { %v580_v48 = vadd.f32 %v579_v40, %v578_v34  ;;  %v587_v49 = vadd.f32 %v586_v42, %v585_v35 }
  0x9b   : > { %v505_v50 = vsub.f32 0.0, %v497_v43  ;;  %v506_v51 = vsub.f32 0.0, %v504_v44  ;;  %v551_v52 = vsub.f32 0.0, %v543_v45  ;;  %v552_v53 = vsub.f32 0.0, %v550_v47 }
  0x9c   : > { %v590_v55 = vcombine.low %v580_v48, %v587_v49 }
  0x9d   : > { %v509_v56 = vcombine.low %v505_v50, %v506_v51  ;;  %v555_v57 = vcombine.low %v551_v52, %v552_v53 }
  0x9e   : > { %v597_v58 = vrot.slane %v590_v55, %v515_v46 }
  0x9f   : > { %v516_v59 = vrot.slane %v509_v56, %v515_v46  ;;  %v562_v60 = vrot.slane %v555_v57, %v515_v46 }
  0xa0   : > { %v604_v0 = vrot.slane %v597_v58, %v515_v46 }
  0xa1   : > { %v523_v1 = vrot.slane %v516_v59, %v515_v46  ;;  %v569_v2 = vrot.slane %v562_v60, %v515_v46 }
  0xa2   : > { %v606_v5 = vadd.f32 %v604_v0, %v573_v61 }
  0xa3   : > { %v525_v41 = vadd.f32 %v523_v1, %v485_v62  ;;  %v571_v54 = vadd.f32 %v569_v2, %v531_v63 }
  0xa4   : > { %607 = vst.msk [vmem:[#allocation4] sm:$0x3] %vm1016_vm0, %v606_v5 }
  0xa5   : > { %530 = vst.msk [vmem:[#allocation2] sm:$0x3] %vm1016_vm0, %v525_v41  ;;  %572 = vst.msk [vmem:[#allocation3] sm:$0x3] %vm1016_vm0, %v571_v54 }
  0xab   : > { %v690_v8 = vld [vmem:[#allocation4] sm:$0x3] }
  0xac   : > { %v666_v9 = vld [vmem:[#allocation3] sm:$0x3]  ;;  %v641_v22 = vld [vmem:[#allocation2] sm:$0x3]  ;;  %v695_v10 = vrot.slane %v690_v8, %v1032_v6  ;;  %v699_v23 = vrot.slane %v690_v8, %v1035_v7 }
  0xad   : > { %v671_v11 = vrot.slane %v666_v9, %v1032_v6  ;;  %v675_v12 = vrot.slane %v666_v9, %v1035_v7  ;;  %v646_v13 = vrot.slane %v641_v22, %v1032_v6  ;;  %v650_v14 = vrot.slane %v641_v22, %v1035_v7 }
  0xae   : > { %v702_v20 = vsel %vm653_vm5, %v695_v10, 0.0  ;;  %v703_v21 = vsel %vm653_vm5, %v699_v23, 0.0 }
  0xaf   : > { %v678_v15 = vsel %vm653_vm5, %v671_v11, 0.0  ;;  %v679_v16 = vsel %vm653_vm5, %v675_v12, 0.0  ;;  %v654_v3 = vsel %vm653_vm5, %v646_v13, 0.0  ;;  %v655_v17 = vsel %vm653_vm5, %v650_v14, 0.0 }
  0xb0   : > { %v680_v18 = vadd.f32 %v679_v16, %v678_v15  ;;  %v656_v19 = vadd.f32 %v655_v17, %v654_v3  ;;  %v704_v24 = vadd.f32 %v703_v21, %v702_v20 }
  0xb2   : > { %681 = vadd.xlane.f32.xlu1 %v680_v18  ;;  %657 = vadd.xlane.f32.xlu0 %v656_v19 }
  0xb6   : > { %705 = vadd.xlane.f32.xlu1 %v704_v24 }
 0x13b   : > { %v682_v25 = vpop.xlane.xlu1 %681  ;;  %v658_v26 = vpop.xlane.xlu0 %657 }
 0x13c   : > { %v683_v27 = vrot.slane %v682_v25, 4  ;;  %v659_v28 = vrot.slane %v658_v26, 4 }
 0x13e   : > { %v684_v6 = vadd.f32 %v683_v27, %v682_v25  ;;  %v660_v29 = vadd.f32 %v659_v28, %v658_v26 }
 0x13f   : > { %v706_v7 = vpop.xlane.xlu1 %705 }
 0x140   : > { %v685_v30 = vrot.slane %v684_v6, 2  ;;  %v661_v31 = vrot.slane %v660_v29, 2  ;;  %v707_v32 = vrot.slane %v706_v7, 4 }
 0x142   : > { %v708_v33 = vadd.f32 %v707_v32, %v706_v7  ;;  %v662_v34 = vadd.f32 %v661_v31, %v660_v29  ;;  %v686_v35 = vadd.f32 %v685_v30, %v684_v6 }
 0x144   : > { %v709_v36 = vrot.slane %v708_v33, 2  ;;  %v663_v37 = vrot.slane %v662_v34, 1  ;;  %v687_v38 = vrot.slane %v686_v35, 1 }
 0x146   : > { %v710_v39 = vadd.f32 %v709_v36, %v708_v33  ;;  %v664_v40 = vadd.f32 %v663_v37, %v662_v34  ;;  %v688_v42 = vadd.f32 %v687_v38, %v686_v35 }
 0x148   : > { %883 = vpush %v664_v40  ;;  %v711_v43 = vrot.slane %v710_v39, 1 }
 0x149   : > { %885 = vpush %v688_v42 }
 0x14a   : > { %v712_v44 = vadd.f32 %v711_v43, %v710_v39 }
 0x14c   : > { %887 = vpush %v712_v44 }
 0x179   : > { %s884_s16 = spop %883 }
 0x17a   : > { %s886_s17 = spop %885  ;;  %v721_v48 = vstv %s884_s16 }
 0x17b   : > { %v719_v47 = vstv %s886_s17 }
 0x17d   : > { %s888_s18 = spop %887 }
 0x17e   : > { %v717_v45 = vstv %s888_s18 }
 0x17f   : > { %v718_v46 = vsel %vm716_vm6, %v717_v45, 0.0 }
 0x180   : > { %v720_v49 = vsel %vm715_vm7, %v719_v47, %v718_v46 }
 0x181   : > { %v722_v50 = vsel %vm714_vm8, %v721_v48, %v720_v49 }
 0x182   : > { %724 = vst.msk [vmem:[%s338_s24] sm:$0xff] %vm723_vm9, %v722_v50 }
 0x183 PF: > { %s16_s20 = sadd.s32 1, %s957_s20   ;;  %s1125_s18 = smov %s953_s19 }
 0x184   : > { %p13_p6 = scmp.ge.s32.totalorder %s16_s20, 4   ;;  %s1126_s19 = smov %s1128_s21 }
 0x186   :  { %15 = sbr.rel (!%p13_p6) target bundleno = 2 (0x2), region = 92 }

</bundles_post_ra>
